<compile_context>
chip_gen: v7x
topology: tpu7x:2x2x1
jax: 0.10.0
libtpu: 0.0.40
codegen_flags: <defaults>
</compile_context>

<pallas_src>
import functools

import jax
import jax.numpy as jnp
from jax.experimental import pallas as pl
from jax.experimental.pallas import tpu as pltpu

LANE = 128            # TPU vreg lane width
SUBLANE_BF16 = 16     # bf16 sublane packing granularity


def _round_up(x, m):
    return (x + m - 1) // m * m


def _pad2d(a, rows, cols):
    return jnp.pad(a, ((0, rows - a.shape[0]), (0, cols - a.shape[1])))


# ---------------------------------------------------------------------------
# Kernel
# ---------------------------------------------------------------------------
def make_wholefish_kernel(w_row_starts, w_row_sizes, relu_flags):
    """Stack of (matmul + bias [+ relu]) layers.

    Weights: one resident bf16 (R, 128) ref, addressed with static 16-aligned
    row slices.  Biases: one resident f32 ref, loaded once before the loop.
    Dot operands are bf16 (fast MXU path), accumulation and elementwise math
    stay f32."""
    n_layers = len(relu_flags)

    def kernel(x_ref, w_ref, b_ref, o_ref):
        biases = b_ref[...]                        # (Rb, 128) f32, single load
        h = x_ref[...]                             # (TB, n_in) f32
        for i in range(n_layers):
            r0 = w_row_starts[i]
            w = w_ref[r0:r0 + w_row_sizes[i], :]   # (K_i, 128) bf16, static slice
            h = jnp.dot(h.astype(jnp.bfloat16), w,
                        preferred_element_type=jnp.float32)
            h = h + biases[i:i + 1, :]             # f32 bias add
            if relu_flags[i]:
                h = jnp.maximum(h, 0.0)
        o_ref[...] = h.astype(o_ref.dtype)         # lane-dense (TB, 128) bf16 store

    return kernel


# ---------------------------------------------------------------------------
# Parameter packing (wrapper-side, runs once)
# ---------------------------------------------------------------------------
def pack_wholefish_params(params):
    """params: list of (W_t, b) with W_t (in, out) and b (1, out), f32, ordered
    [input, hidden..., mlp_output, classifier].

    Folds the last two linears (no nonlinearity between them), zero-pads every
    layer to 128 output lanes, and packs:
      * all weights into one bf16 (R, 128) buffer (16-aligned row starts),
      * all biases into one f32 (round_up(n_layers, 8), 128) buffer."""
    *front, (w_out, b_out), (w_cls, b_cls) = params

    # Exact algebraic fold of MLP output layer + linear classifier (f32).
    w_fused = w_out @ w_cls                   # (width, num_classes)
    b_fused = b_out @ w_cls + b_cls           # (1, num_classes)

    layers = list(front) + [(w_fused, b_fused)]
    relu_flags = tuple([True] * len(front) + [False])

    # Contraction (K) dims seen by the kernel: layer 0 contracts raw x lanes,
    # later layers contract the 128-lane zero-padded activation.
    k_dims = [layers[0][0].shape[0]] + [LANE] * (len(layers) - 1)

    w_blocks, b_rows, w_row_starts, w_row_sizes = [], [], [], []
    row = 0
    for (w, b), k in zip(layers, k_dims):
        w_row_starts.append(row)
        w_row_sizes.append(k)
        padded_rows = _round_up(k, SUBLANE_BF16)     # keep next start 16-aligned
        w_blocks.append(_pad2d(w.astype(jnp.float32), padded_rows, LANE))
        b_rows.append(_pad2d(b.astype(jnp.float32), 1, LANE))
        row += padded_rows

    w_packed = jnp.concatenate(w_blocks, axis=0).astype(jnp.bfloat16)
    b_packed = _pad2d(jnp.concatenate(b_rows, axis=0),
                      _round_up(len(layers), 8), LANE)          # f32, no neg pad

    return w_packed, b_packed, tuple(w_row_starts), tuple(w_row_sizes), relu_flags


# ---------------------------------------------------------------------------
# Tiling policy
# ---------------------------------------------------------------------------
def _pick_block_batch(batch):
    # Small batches: one tile (grid=1) — per-grid-step overhead dominates
    # anything a 256-row MXU could gain from splitting.
    if batch <= 512:
        return _round_up(batch, 8)
    # Large batches: big tiles (>=256 fills the v6e/v7x 256-row MXU, >=128 on
    # v5e), preferring a divisor (no boundary pad) and grid >= 2 so the
    # "parallel" batch axis can be split across v7x's two TensorCores.
    # VMEM is not a limiter here (even TB=2048 is a few MiB double-buffered).
    for tb in (2048, 1024, 512, 256):
        if batch % tb == 0 and batch // tb >= 2:
            return tb
    return 512


# ---------------------------------------------------------------------------
# Forward wrapper
# ---------------------------------------------------------------------------
def wholefish_forward(x, w_packed, b_packed, w_row_starts, w_row_sizes,
                      relu_flags, block_batch=None):
    """Returns padded (B_pad, 128) bf16 logits; real classes are
    out[:, :num_classes].  The slice is left to the consumer so it can fuse
    under jit (the padded slab can also be consumed directly)."""
    batch, n_in = x.shape

    if block_batch is None:
        block_batch = _pick_block_batch(batch)
    padded_batch = _round_up(batch, block_batch)
    if padded_batch != batch:
        # Boundary pad; avoided by the default policy when block_batch divides batch.
        x = jnp.pad(x, ((0, padded_batch - batch), (0, 0)))
    grid = (padded_batch // block_batch,)

    kernel = make_wholefish_kernel(w_row_starts, w_row_sizes, relu_flags)

    flops = 2 * padded_batch * sum(k * LANE for k in w_row_sizes)
    bytes_accessed = (w_packed.size * 2 + b_packed.size * 4
                      + padded_batch * n_in * 4 + padded_batch * LANE * 2)
    cost = pl.CostEstimate(flops=flops, transcendentals=0,
                           bytes_accessed=bytes_accessed)

    out = pl.pallas_call(
        kernel,
        out_shape=jax.ShapeDtypeStruct((padded_batch, LANE), jnp.bfloat16),
        grid=grid,
        in_specs=[
            pl.BlockSpec((block_batch, n_in), lambda i: (i, 0)),   # x batch tile
            pl.BlockSpec(w_packed.shape, lambda i: (0, 0)),        # resident bf16 weights
            pl.BlockSpec(b_packed.shape, lambda i: (0, 0)),        # resident f32 biases
        ],
        out_specs=pl.BlockSpec((block_batch, LANE), lambda i: (i, 0)),
        compiler_params=pltpu.CompilerParams(
            dimension_semantics=("parallel",)),
        cost_estimate=cost,
    )(x, w_packed, b_packed)
    return out


# ---------------------------------------------------------------------------
# Parameter init (matches PyTorch nn.Linear shapes / init bounds)
# ---------------------------------------------------------------------------
def init_wholefish_params(key, n_inputs, mlp_width, mlp_depth, num_classes):
    layer_dims = [(n_inputs, mlp_width)]
    for _ in range(mlp_depth - 2):
        layer_dims.append((mlp_width, mlp_width))
    layer_dims.append((mlp_width, mlp_width))       # MLP output (n_outputs == width)
    layer_dims.append((mlp_width, num_classes))     # linear classifier

    params = []
    for (fan_in, fan_out) in layer_dims:
        key, kw, kb = jax.random.split(key, 3)
        bound = 1.0 / jnp.sqrt(jnp.float32(fan_in))
        w = jax.random.uniform(kw, (fan_out, fan_in), jnp.float32, -bound, bound)
        b = jax.random.uniform(kb, (1, fan_out), jnp.float32, -bound, bound)
        params.append((w.T, b))                     # store transposed: (in, out)

    # relu after input layer and each hidden layer; none after MLP output / classifier
    relu_flags = [True] * (1 + (mlp_depth - 2)) + [False, False]
    return params, relu_flags


def reference_forward(x, params, relu_flags):
    h = x
    for (w_t, b), flag in zip(params, relu_flags):
        h = h @ w_t + b
        if flag:
            h = jnp.maximum(h, 0.0)
    return h


# ---------------------------------------------------------------------------
if __name__ == "__main__":
    hparams = {
        "mlp_width": 64,
        "mlp_depth": 3,
        "mlp_dropout": 0.0,            # identity dropout -> exact forward match
        "nonlinear_classifier": False,
    }
    # TODO(synk): mlp_dropout > 0 (training-mode dropout) is not implemented.
    n_inputs = 32
    num_classes = 8
    batch = 64

    key = jax.random.PRNGKey(0)
    key, kx = jax.random.split(key)
    x = jax.random.normal(kx, (batch, n_inputs), jnp.float32)

    params, relu_flags_full = init_wholefish_params(
        key, n_inputs, hparams["mlp_width"], hparams["mlp_depth"], num_classes)

    w_packed, b_packed, w_row_starts, w_row_sizes, relu_flags = \
        pack_wholefish_params(params)

    # batch=64 -> one (64, n_in) tile, grid=(1,), no wrapper-side pad copies.
    fwd = jax.jit(lambda x_, w_, b_: wholefish_forward(
        x_, w_, b_, w_row_starts, w_row_sizes, relu_flags))

    logits_padded = jax.block_until_ready(fwd(x, w_packed, b_packed))
    assert logits_padded.shape == (batch, LANE)

    out = jnp.asarray(logits_padded[:batch, :num_classes], jnp.float32)
    ref = reference_forward(x, params, relu_flags_full)
    assert out.shape == (batch, num_classes)
    # bf16 MXU operands + bf16 logit writeback -> ~1e-2 relative vs f32 reference
    assert jnp.allclose(out, ref, atol=5e-2, rtol=5e-2), \
        float(jnp.max(jnp.abs(out - ref)))

    print("KERNEL_OK")
</pallas_src>

<mosaic_0001>
module attributes {stable_mosaic.version = 11 : i64} {
  func.func @kernel(%arg0: i32, %arg1: memref<64x32xf32, #tpu.memory_space<vmem>>, %arg2: memref<288x128xbf16, #tpu.memory_space<vmem>>, %arg3: memref<8x128xf32, #tpu.memory_space<vmem>>, %arg4: memref<64x128xbf16, #tpu.memory_space<vmem>>) attributes {dimension_semantics = [#tpu.dimension_semantics<parallel>], iteration_bounds = array<i64: 1>, scalar_prefetch = 0 : i64, scratch_operands = 0 : i64, tpu.core_type = #tpu.core_type<tc>, window_params = [{transform_indices = @transform_0, window_bounds = array<i64: 64, 32>}, {pipeline_mode = #tpu.pipeline_mode<synchronous>, transform_indices = @transform_1, window_bounds = array<i64: 288, 128>}, {pipeline_mode = #tpu.pipeline_mode<synchronous>, transform_indices = @transform_2, window_bounds = array<i64: 8, 128>}, {transform_indices = @transform_3, window_bounds = array<i64: 64, 128>}]} {
    %c0 = arith.constant 0 : index
    %c0_0 = arith.constant 0 : index
    %0 = vector.load %arg3[%c0, %c0_0] : memref<8x128xf32, #tpu.memory_space<vmem>>, vector<8x128xf32>
    %c0_1 = arith.constant 0 : index
    %c0_2 = arith.constant 0 : index
    %1 = vector.load %arg1[%c0_1, %c0_2] : memref<64x32xf32, #tpu.memory_space<vmem>>, vector<64x32xf32>
    %c0_3 = arith.constant 0 : index
    %c0_4 = arith.constant 0 : index
    %2 = vector.load %arg2[%c0_3, %c0_4] : memref<288x128xbf16, #tpu.memory_space<vmem>>, vector<32x128xbf16>
    %3 = arith.truncf %1 : vector<64x32xf32> to vector<64x32xbf16>
    %cst = arith.constant dense<0.000000e+00> : vector<64x128xf32>
    %4 = tpu.matmul %3, %2, %cst {dimension_numbers = #tpu.dot_dimension_numbers<[1], [0], [0], [1], [0, 0, 1, 1], [], []>} : vector<64x32xbf16>, vector<32x128xbf16>, vector<64x128xf32> -> vector<64x128xf32>
    %5 = vector.extract_strided_slice %0 {offsets = [0, 0], sizes = [1, 128], strides = [1, 1]} : vector<8x128xf32> to vector<1x128xf32>
    %6 = vector.broadcast %5 : vector<1x128xf32> to vector<64x128xf32>
    %7 = arith.addf %4, %6 : vector<64x128xf32>
    %cst_5 = arith.constant 0.000000e+00 : f32
    %8 = vector.broadcast %cst_5 : f32 to vector<64x128xf32>
    %9 = arith.maximumf %7, %8 : vector<64x128xf32>
    %c32 = arith.constant 32 : index
    %c0_6 = arith.constant 0 : index
    %10 = vector.load %arg2[%c32, %c0_6] : memref<288x128xbf16, #tpu.memory_space<vmem>>, vector<128x128xbf16>
    %11 = arith.truncf %9 : vector<64x128xf32> to vector<64x128xbf16>
    %cst_7 = arith.constant dense<0.000000e+00> : vector<64x128xf32>
    %12 = tpu.matmul %11, %10, %cst_7 {dimension_numbers = #tpu.dot_dimension_numbers<[1], [0], [0], [1], [0, 0, 1, 1], [], []>} : vector<64x128xbf16>, vector<128x128xbf16>, vector<64x128xf32> -> vector<64x128xf32>
    %13 = vector.extract_strided_slice %0 {offsets = [1, 0], sizes = [1, 128], strides = [1, 1]} : vector<8x128xf32> to vector<1x128xf32>
    %14 = vector.broadcast %13 : vector<1x128xf32> to vector<64x128xf32>
    %15 = arith.addf %12, %14 : vector<64x128xf32>
    %cst_8 = arith.constant 0.000000e+00 : f32
    %16 = vector.broadcast %cst_8 : f32 to vector<64x128xf32>
    %17 = arith.maximumf %15, %16 : vector<64x128xf32>
    %c160 = arith.constant 160 : index
    %c0_9 = arith.constant 0 : index
    %18 = vector.load %arg2[%c160, %c0_9] : memref<288x128xbf16, #tpu.memory_space<vmem>>, vector<128x128xbf16>
    %19 = arith.truncf %17 : vector<64x128xf32> to vector<64x128xbf16>
    %cst_10 = arith.constant dense<0.000000e+00> : vector<64x128xf32>
    %20 = tpu.matmul %19, %18, %cst_10 {dimension_numbers = #tpu.dot_dimension_numbers<[1], [0], [0], [1], [0, 0, 1, 1], [], []>} : vector<64x128xbf16>, vector<128x128xbf16>, vector<64x128xf32> -> vector<64x128xf32>
    %21 = vector.extract_strided_slice %0 {offsets = [2, 0], sizes = [1, 128], strides = [1, 1]} : vector<8x128xf32> to vector<1x128xf32>
    %22 = vector.broadcast %21 : vector<1x128xf32> to vector<64x128xf32>
    %23 = arith.addf %20, %22 : vector<64x128xf32>
    %24 = arith.truncf %23 : vector<64x128xf32> to vector<64x128xbf16>
    %c0_11 = arith.constant 0 : index
    %c0_12 = arith.constant 0 : index
    %25 = vector.load %arg4[%c0_11, %c0_12] : memref<64x128xbf16, #tpu.memory_space<vmem>>, vector<64x128xbf16>
    tpu.vector_store %arg4[%c0_11, %c0_12], %24 {strides = array<i32>} : memref<64x128xbf16, #tpu.memory_space<vmem>>, vector<64x128xbf16>,
    return
  }
  func.func @transform_0(%arg0: i32) -> (i32, i32) {
    %c0_i32 = arith.constant 0 : i32
    %c0_i32_0 = arith.constant 0 : i32
    return %arg0, %c0_i32 : i32, i32
  }
  func.func @transform_1(%arg0: i32) -> (i32, i32) {
    %c0_i32 = arith.constant 0 : i32
    %c0_i32_0 = arith.constant 0 : i32
    %c0_i32_1 = arith.constant 0 : i32
    return %c0_i32, %c0_i32_0 : i32, i32
  }
  func.func @transform_2(%arg0: i32) -> (i32, i32) {
    %c0_i32 = arith.constant 0 : i32
    %c0_i32_0 = arith.constant 0 : i32
    %c0_i32_1 = arith.constant 0 : i32
    return %c0_i32, %c0_i32_0 : i32, i32
  }
  func.func @transform_3(%arg0: i32) -> (i32, i32) {
    %c0_i32 = arith.constant 0 : i32
    %c0_i32_0 = arith.constant 0 : i32
    return %arg0, %c0_i32 : i32, i32
  }
}

</mosaic_0001>

<bundles_post_ra>
// kernel: _lambda_.1
= control target key start
LH: loop header
LB: loop body
LE: loop exit
PB: predicated region body
PF: predicated region fallthrough
CT: control target
= control target key end

     0   :  { %8 = vsyncpa [#allocation3], 0  ;;  %s804_s0 = inlined_call_operand.vmem [shape: f32[64,32], index: 0, kind: input, shape index: {}]   ;;  %s805_s1 = inlined_call_operand.hbm [shape: bf16[288,128], index: 1, kind: input, shape index: {}]   ;;  %s806_s2 = inlined_call_operand.vmem [shape: f32[8,128], index: 2, kind: input, shape index: {}]   ;;  %s807_s3 = inlined_call_operand.hbm [shape: bf16[64,128], index: 3, kind: output, shape index: {}]  }
   0x1   :  { %9 = vsyncpa [#allocation4], 0  ;;  %s709_s12 = smov [#allocation2]   ;;  %s661_s16 = scalar_lea.hbm %s805_s1, 2304 }
   0x2   :  { %s17_s13 = sshll.u32 %s709_s12, 4  ;;  %p662_p0 = scmp.ne.s32.totalorder %s805_s1, %s661_s16  ;;  %s18_s13 = int_to_ptr.vmem [resolvable:$true] %s17_s13 }
   0x3   :  { %p665_p1 = scmp.lt.u32.totalorder %s661_s16, %s805_s1 }
   0x5   :  { %p667_p2 = pnand %p665_p1, %p662_p0 }
   0x7   :  { %670 = shalt.err (!%p667_p2)
}
   0x8   :  { %s671_s21 = scalar_lea.vmem %s18_s13, 2304  ;;  %p676_p4 = scmp.lt.s32.totalorder %s18_s13, %s18_s13 }
   0x9   :  { %p672_p3 = scmp.ne.s32.totalorder %s18_s13, %s671_s21  ;;  %p677_p5 = scmp.lt.s32.totalorder %s671_s21, %s671_s21 }
   0xb   :  { %p678_p6 = por %p677_p5, %p676_p4 }
   0xd   :  { %p679_p7 = pnand %p678_p6, %p672_p3 }
   0xf   :  { %682 = shalt.err (!%p679_p7)
}
  0x10   :  { %s710_s22 = smov 64   ;;  %s711_s23 = smov 4  }
  0x11   :  { %23 = dma.hbm_to_vmem [thread:$0]  %s805_s1, 2304, %s18_s13, [#allocation3], %s710_s22, %s710_s22, %s711_s23  }
  0x12   :  { %705 = dma.done.wait [#allocation3], 2304  }
  0x13   :  { %706 = vsyncadd [#allocation3], 4294964992  ;;  %v643_v0 = vld [vmem:[#allocation2] sm:$0xff]   ;;  %v644_v1 = vld [vmem:[#allocation2 + $0x8] sm:$0xff]   ;;  %vm63_vm0 = vcmask 261120   ;;  %v47_v28 = vlaneseq }
  0x14   :  { %579 = vmatprep.subr.bf16.mxu0 %v643_v0  ;;  %v31_v2 = vld [vmem:[%s804_s0] sm:$0xff]  ;;  %v32_v3 = vld [vmem:[%s804_s0 + $0x8] sm:$0xff]  ;;  %v33_v5 = vld [vmem:[%s804_s0 + $0x10] sm:$0xff] }
  0x15   :  { %580 = vmatpush3.bf16.msra.mxu0 %v643_v0  ;;  %v43_v4 = vpack.c.bf16 %v32_v3, %v31_v2  ;;  %v34_v6 = vld [vmem:[%s804_s0 + $0x18] sm:$0xff]  ;;  %v35_v7 = vld [vmem:[%s804_s0 + $0x20] sm:$0xff]  ;;  %v36_v8 = vld [vmem:[%s804_s0 + $0x28] sm:$0xff]  ;;  %v776_v29 = vshrl.u32 %v47_v28, 7 }
  0x16   :  { %581 = vmatprep.subr.bf16.mxu0 %v644_v1  ;;  %v645_v9 = vld [vmem:[#allocation2 + $0x10] sm:$0xff]   ;;  %v44_v10 = vpack.c.bf16 %v34_v6, %v33_v5  ;;  %v646_v11 = vld [vmem:[#allocation2 + $0x18] sm:$0xff]   ;;  %v45_v12 = vpack.c.bf16 %v36_v8, %v35_v7  ;;  %v647_v13 = vld [vmem:[#allocation2 + $0x20] sm:$0xff]  }
  0x17   :  { %583 = vmatprep.mubr.msk.bf16.mxu0 %vm63_vm0, %v43_v4  ;;  %591 = vmatprep.subr.bf16.mxu1 %v645_v9  ;;  %v37_v14 = vld [vmem:[%s804_s0 + $0x30] sm:$0xff]  ;;  %v38_v15 = vld [vmem:[%s804_s0 + $0x38] sm:$0xff]  ;;  %v648_v16 = vld [vmem:[#allocation2 + $0x28] sm:$0xff]   ;;  %v49_v30 = vsub.s32 0, %v776_v29  ;;  %v171_v63 = vsub.s32 1, %v776_v29 }
  0x18   :  { %592 = vmatpush3.bf16.msra.mxu1 %v645_v9  ;;  %v46_v17 = vpack.c.bf16 %v38_v15, %v37_v14  ;;  %v649_v18 = vld [vmem:[#allocation2 + $0x30] sm:$0xff]   ;;  %v650_v19 = vld [vmem:[#allocation2 + $0x38] sm:$0xff]   ;;  %v651_v20 = vld [vmem:[#allocation2 + $0x40] sm:$0xff]  }
  0x19   :  { %582 = vmatpush3.bf16.msra.mxu0 %v644_v1  ;;  %593 = vmatprep.subr.bf16.mxu1 %v646_v11  ;;  %v652_v21 = vld [vmem:[#allocation2 + $0x48] sm:$0xff]   ;;  %v653_v22 = vld [vmem:[#allocation2 + $0x50] sm:$0xff]   ;;  %v654_v23 = vld [vmem:[#allocation2 + $0x58] sm:$0xff]  }
  0x1a   :  { %615 = vmatprep.subr.bf16.mxu0 %v653_v22  ;;  %v655_v24 = vld [vmem:[#allocation2 + $0x60] sm:$0xff]   ;;  %v656_v25 = vld [vmem:[#allocation2 + $0x68] sm:$0xff]   ;;  %v657_v26 = vld [vmem:[#allocation2 + $0x70] sm:$0xff]  }
  0x1b   :  { %v658_v27 = vld [vmem:[#allocation2 + $0x78] sm:$0xff]   ;;  %v782_v31 = vld [vmem:[%s806_s2] sm:$0xff]  ;;  %v660_v62 = vld [vmem:[#allocation2 + $0x88] sm:$0xff]   ;;  %s712_s2 = smov [#allocation5]  }
  0x1c   :  { %584 = vmatmul.mubr.msk.bf16.vlgmr.msra.gmra.mrb[0].mxu0 %vm63_vm0, %v44_v10  ;;  %594 = vmatpush3.bf16.msra.mxu1 %v646_v11  ;;  %v50_v32 = vrot.slane %v782_v31, %v49_v30  ;;  %v659_v61 = vld [vmem:[#allocation2 + $0x80] sm:$0xff]   ;;  %v172_v0 = vrot.slane %v782_v31, %v171_v63  ;;  %v316_v30 = vsub.s32 2, %v776_v29  ;;  %s476_s15 = sshll.u32 %s712_s2, 4  ;;  %s477_s15 = int_to_ptr.vmem [resolvable:$true] %s476_s15 }
  0x1d   :  { %587 = vmatprep.mubr.msk.bf16.mxu0 %vm63_vm0, %v45_v12  ;;  %595 = vmatprep.subr.bf16.mxu1 %v647_v13  ;;  %s683_s16 = scalar_lea.vmem %s477_s15, 512  ;;  %p688_p9 = scmp.lt.s32.totalorder %s477_s15, %s477_s15 }
  0x1e   :  { %616 = vmatpush3.bf16.msra.mxu0 %v653_v22  ;;  %p684_p8 = scmp.ne.s32.totalorder %s477_s15, %s683_s16  ;;  %p689_p10 = scmp.lt.s32.totalorder %s683_s16, %s683_s16 }
  0x1f   :  { %617 = vmatprep.subr.bf16.mxu0 %v654_v23 }
  0x20   :  { %596 = vmatpush3.bf16.msra.mxu1 %v647_v13  ;;  %p690_p11 = por %p689_p10, %p688_p9 }
  0x21   :  { %597 = vmatprep.subr.bf16.mxu1 %v648_v16 }
  0x22   :  { %618 = vmatpush3.bf16.msra.mxu0 %v654_v23  ;;  %p691_p12 = pnand %p690_p11, %p684_p8 }
  0x23   :  { %619 = vmatprep.subr.bf16.mxu0 %v655_v24 }
  0x24   :  { %588 = vmatmul.mubr.msk.bf16.gmra.mrb[4].mxu0 %vm63_vm0, %v46_v17  ;;  %598 = vmatpush3.bf16.msra.mxu1 %v648_v16 }
  0x25   :  { %599 = vmatprep.subr.bf16.mxu1 %v649_v18 }
  0x26   :  { %620 = vmatpush3.bf16.msra.mxu0 %v655_v24 }
  0x27   :  { %621 = vmatprep.subr.bf16.mxu0 %v656_v25 }
  0x28   :  { %600 = vmatpush3.bf16.msra.mxu1 %v649_v18 }
  0x29   :  { %601 = vmatprep.subr.bf16.mxu1 %v650_v19 }
  0x2a   :  { %622 = vmatpush3.bf16.msra.mxu0 %v656_v25 }
  0x2b   :  { %623 = vmatprep.subr.bf16.mxu0 %v657_v26 }
  0x2c   :  { %602 = vmatpush3.bf16.msra.mxu1 %v650_v19 }
  0x2d   :  { %603 = vmatprep.subr.bf16.mxu1 %v651_v20 }
  0x2e   :  { %624 = vmatpush3.bf16.msra.mxu0 %v657_v26 }
  0x2f   :  { %625 = vmatprep.subr.bf16.mxu0 %v658_v27 }
  0x30   :  { %604 = vmatpush3.bf16.msra.mxu1 %v651_v20 }
  0x31   :  { %605 = vmatprep.subr.bf16.mxu1 %v652_v21 }
  0x32   :  { %626 = vmatpush3.bf16.msra.mxu0 %v658_v27 }
  0x33   :  { %627 = vmatprep.subr.bf16.mxu0 %v659_v61 }
  0x34   :  { %606 = vmatpush3.bf16.msra.mxu1 %v652_v21 }
  0x36   :  { %628 = vmatpush3.bf16.msra.mxu0 %v659_v61 }
  0x37   :  { %629 = vmatprep.subr.bf16.mxu0 %v660_v62 }
  0x3a   :  { %630 = vmatpush3.bf16.msra.mxu0 %v660_v62 }
  0xef   :  { %v585_v33 = vpop.f32.mrb[0].mxu0 }
  0xf0   :  { %v119_v34 = vadd.f32 %v585_v33, %v50_v32  ;;  %v110_v35 = vpop.f32.mrb[1].mxu0 }
  0xf1   :  { %v111_v36 = vadd.f32 %v110_v35, %v50_v32  ;;  %v586_v37 = vpop.f32.mrb[2].mxu0 }
  0xf2   :  { %v122_v38 = vadd.f32 %v586_v37, %v50_v32  ;;  %v113_v39 = vpop.f32.mrb[3].mxu0  ;;  %v143_v41 = vmax.f32 %v119_v34, 0.0 }
  0xf3   :  { %v114_v40 = vadd.f32 %v113_v39, %v50_v32  ;;  %v141_v43 = vmax.f32 %v111_v36, 0.0 }
  0xf4   :  { %v144_v42 = vmax.f32 %v122_v38, 0.0 }
  0xf5   :  { %v142_v44 = vmax.f32 %v114_v40, 0.0 }
  0xf6   :  { %v166_v45 = vpack.c.bf16 %v144_v42, %v143_v41 }
  0xf7   :  { %v589_v46 = vpop.f32.mrb[4].mxu0  ;;  %v165_v47 = vpack.c.bf16 %v142_v44, %v141_v43 }
  0xf8   :  { %v135_v48 = vadd.f32 %v589_v46, %v50_v32  ;;  %v126_v49 = vpop.f32.mrb[5].mxu0 }
  0xf9   :  { %v127_v50 = vadd.f32 %v126_v49, %v50_v32  ;;  %v590_v51 = vpop.f32.mrb[6].mxu0  ;;  %607 = vmatprep.mubr.bf16.mxu1 %v165_v47 }
  0xfa   :  { %v138_v52 = vadd.f32 %v590_v51, %v50_v32  ;;  %v129_v53 = vpop.f32.mrb[7].mxu0  ;;  %608 = vmatmul.mubr.bf16.vlgmr.msra.gmra.mrb[0].mxu1 %v166_v45  ;;  %v147_v55 = vmax.f32 %v135_v48, 0.0 }
  0xfb   :  { %v130_v54 = vadd.f32 %v129_v53, %v50_v32  ;;  %v145_v57 = vmax.f32 %v127_v50, 0.0  ;;  %v317_v32 = vrot.slane %v782_v31, %v316_v30 }
  0xfc   :  { %v148_v56 = vmax.f32 %v138_v52, 0.0 }
  0xfd   :  { %v146_v58 = vmax.f32 %v130_v54, 0.0 }
  0xfe   :  { %v168_v59 = vpack.c.bf16 %v148_v56, %v147_v55 }
  0xff   :  { %v167_v60 = vpack.c.bf16 %v146_v58, %v145_v57 }
 0x101   :  { %611 = vmatprep.mubr.bf16.mxu1 %v167_v60 }
 0x102   :  { %612 = vmatmul.mubr.bf16.gmra.mrb[4].mxu1 %v168_v59 }
 0x1cd   :  { %v609_v1 = vpop.f32.mrb[0].mxu1 }
 0x1ce   :  { %v264_v2 = vadd.f32 %v609_v1, %v172_v0  ;;  %v255_v3 = vpop.f32.mrb[1].mxu1 }
 0x1cf   :  { %v256_v4 = vadd.f32 %v255_v3, %v172_v0  ;;  %v610_v5 = vpop.f32.mrb[2].mxu1 }
 0x1d0   :  { %v267_v6 = vadd.f32 %v610_v5, %v172_v0  ;;  %v258_v7 = vpop.f32.mrb[3].mxu1  ;;  %v288_v9 = vmax.f32 %v264_v2, 0.0 }
 0x1d1   :  { %v259_v8 = vadd.f32 %v258_v7, %v172_v0  ;;  %v286_v11 = vmax.f32 %v256_v4, 0.0 }
 0x1d2   :  { %v289_v10 = vmax.f32 %v267_v6, 0.0 }
 0x1d3   :  { %v287_v12 = vmax.f32 %v259_v8, 0.0 }
 0x1d4   :  { %v311_v13 = vpack.c.bf16 %v289_v10, %v288_v9 }
 0x1d5   :  { %v310_v14 = vpack.c.bf16 %v287_v12, %v286_v11  ;;  %v613_v15 = vpop.f32.mrb[4].mxu1 }
 0x1d6   :  { %v280_v16 = vadd.f32 %v613_v15, %v172_v0  ;;  %v271_v17 = vpop.f32.mrb[5].mxu1 }
 0x1d7   :  { %v272_v18 = vadd.f32 %v271_v17, %v172_v0  ;;  %v614_v19 = vpop.f32.mrb[6].mxu1  ;;  %631 = vmatprep.mubr.bf16.mxu0 %v310_v14 }
 0x1d8   :  { %v283_v20 = vadd.f32 %v614_v19, %v172_v0  ;;  %v274_v21 = vpop.f32.mrb[7].mxu1  ;;  %632 = vmatmul.mubr.bf16.vlgmr.msra.gmra.mrb[8].mxu0 %v311_v13  ;;  %v292_v23 = vmax.f32 %v280_v16, 0.0 }
 0x1d9   :  { %v275_v22 = vadd.f32 %v274_v21, %v172_v0  ;;  %v290_v25 = vmax.f32 %v272_v18, 0.0 }
 0x1da   :  { %v293_v24 = vmax.f32 %v283_v20, 0.0 }
 0x1db   :  { %v291_v26 = vmax.f32 %v275_v22, 0.0 }
 0x1dc   :  { %v313_v27 = vpack.c.bf16 %v293_v24, %v292_v23 }
 0x1dd   :  { %v312_v28 = vpack.c.bf16 %v291_v26, %v290_v25 }
 0x1df   :  { %635 = vmatprep.mubr.bf16.mxu0 %v312_v28 }
 0x1e0   :  { %636 = vmatmul.mubr.bf16.gmra.mrb[12].mxu0 %v313_v27 }
 0x2ab   :  { %v633_v33 = vpop.f32.mrb[8].mxu0 }
 0x2ac   :  { %v400_v34 = vpop.f32.mrb[9].mxu0  ;;  %v409_v36 = vadd.f32 %v633_v33, %v317_v32 }
 0x2ad   :  { %v634_v35 = vpop.f32.mrb[10].mxu0  ;;  %v401_v39 = vadd.f32 %v400_v34, %v317_v32 }
 0x2ae   :  { %v412_v37 = vadd.f32 %v634_v35, %v317_v32  ;;  %v403_v38 = vpop.f32.mrb[11].mxu0 }
 0x2af   :  { %v404_v40 = vadd.f32 %v403_v38, %v317_v32 }
 0x2b0   :  { %v534_v41 = vpack.c.bf16 %v412_v37, %v409_v36 }
 0x2b1   :  { %v529_v42 = vpack.c.bf16 %v404_v40, %v401_v39 }
 0x2b2   :  { %546 = vst [vmem:[#allocation5 + $0x8] sm:$0xff] %v534_v41  }
 0x2b3   :  { %530 = vst [vmem:[#allocation5] sm:$0xff] %v529_v42   ;;  %v637_v43 = vpop.f32.mrb[12].mxu0 }
 0x2b4   :  { %v416_v44 = vpop.f32.mrb[13].mxu0  ;;  %v425_v46 = vadd.f32 %v637_v43, %v317_v32 }
 0x2b5   :  { %v638_v45 = vpop.f32.mrb[14].mxu0  ;;  %v417_v31 = vadd.f32 %v416_v44, %v317_v32 }
 0x2b6   :  { %v428_v47 = vadd.f32 %v638_v45, %v317_v32  ;;  %v419_v29 = vpop.f32.mrb[15].mxu0 }
 0x2b7   :  { %v420_v48 = vadd.f32 %v419_v29, %v317_v32 }
 0x2b8   :  { %v544_v49 = vpack.c.bf16 %v428_v47, %v425_v46 }
 0x2b9   :  { %v539_v50 = vpack.c.bf16 %v420_v48, %v417_v31 }
 0x2ba   :  { %548 = vst [vmem:[#allocation5 + $0x18] sm:$0xff] %v544_v49  }
 0x2bb   :  { %547 = vst [vmem:[#allocation5 + $0x10] sm:$0xff] %v539_v50  }
 0x2bc   :  { %694 = shalt.err (!%p691_p12)
}
 0x2bd   :  { %s695_s19 = scalar_lea.hbm %s807_s3, 512 }
 0x2be   :  { %p696_p13 = scmp.ne.s32.totalorder %s807_s3, %s695_s19  ;;  %p699_p0 = scmp.lt.u32.totalorder %s695_s19, %s807_s3 }
 0x2c0   :  { %p701_p1 = pnand %p699_p0, %p696_p13 }
 0x2c2   :  { %704 = shalt.err (!%p701_p1)
}
 0x2c3   :  { %482 = dma.vmem_to_hbm [thread:$0]  %s477_s15, 512, %s807_s3, [#allocation4], %s710_s22, %s710_s22, %s711_s23  }
 0x2c4   :  { %707 = dma.done.wait [#allocation4], 512  }
 0x2c5   :  { %708 = vsyncadd [#allocation4], 4294966784 }
 0x2c6   :  { %486 = vsyncpa [#allocation3], 1 }
 0x2c7   :  { %487 = vsyncpa [#allocation4], 1 }

</bundles_post_ra>
